<compile_context>
chip_gen: v6e
topology: v6e:2x2x1
jax: 0.10.0
libtpu: 0.0.40
codegen_flags: <defaults>
</compile_context>

<pallas_src>
import functools

import jax
import jax.numpy as jnp
from jax import lax
from jax.experimental import pallas as pl
from jax.experimental.pallas import tpu as pltpu

EPS = 1e-5


def _vmem_limit_bytes():
    # ~48 MiB on 64-MiB-VMEM parts (v7x), ~112 MiB on 128-MiB parts (v5e/v6e).
    default = 48 * 1024 * 1024
    try:
        cap = getattr(pltpu.get_tpu_info(), "vmem_capacity_bytes", None)
        if cap:
            cap = int(cap)
            if cap <= 64 * 1024 * 1024:
                return min(default, cap * 3 // 4)
            return min(112 * 1024 * 1024, cap * 7 // 8)
    except Exception:
        pass
    return default


_VMEM_LIMIT = _vmem_limit_bytes()


def _round_up(x, m):
    return (x + m - 1) // m * m


def _pad_dim(dim, target, align):
    """Return (tile, padded_dim): tile <= max(target, align), padded % tile == 0."""
    if dim <= target:
        t = _round_up(dim, align)
        return t, t
    return target, _round_up(dim, target)


def _pick_k_tile(K):
    for t in (512, 256, 128):
        if K % t == 0:
            return t
    return K  # full contraction dim in one step (always legal)


def _layer_norm(x, g, b):
    mean = jnp.mean(x, axis=-1, keepdims=True)
    var = jnp.mean((x - mean) ** 2, axis=-1, keepdims=True)
    return (x - mean) * lax.rsqrt(var + EPS) * g + b


# ---------------------------- Pallas kernels ----------------------------

def _ln_kernel(x_ref, g_ref, b_ref, o_ref):
    o_ref[...] = _layer_norm(x_ref[...], g_ref[...], b_ref[...]).astype(o_ref.dtype)


def _matmul_kernel(x_ref, w_ref, o_ref, acc_ref):
    # Tiled LM head: bf16 operands, f32 accumulator resident across the K axis.
    @pl.when(pl.program_id(2) == 0)
    def _():
        acc_ref[...] = jnp.zeros_like(acc_ref)

    acc_ref[...] += jnp.dot(x_ref[...], w_ref[...],
                            preferred_element_type=jnp.float32)

    @pl.when(pl.program_id(2) == pl.num_programs(2) - 1)
    def _():
        o_ref[...] = acc_ref[...].astype(o_ref.dtype)


def _block_kernel(x_ref, ln1g, ln1b, lnpg, lnpb, ln2g, ln2b, lnmg, lnmb,
                  wqkv_t, wo_t, w1x_t, w1g_t, w2_t, o_ref, ctx_scr,
                  *, n_heads, tq):
    f32, bf16 = jnp.float32, jnp.bfloat16
    xb = x_ref[0]                       # (T, E) f32 residual stream (this batch elem)
    T, E = xb.shape
    hd = E // n_heads

    # ---- attention branch: pre-LN -> fused QKV (1/sqrt(hd) folded into q weights) ----
    h = _layer_norm(xb, ln1g[...], ln1b[...]).astype(bf16)
    qkv = jnp.dot(h, wqkv_t[...], preferred_element_type=f32)        # (T, 3E) f32
    qkv = qkv.astype(bf16)              # cast ONCE before head-split transposes
    qh = jnp.transpose(qkv[:, :E].reshape(T, n_heads, hd), (1, 0, 2))         # (H,T,hd)
    kh = jnp.transpose(qkv[:, E:2 * E].reshape(T, n_heads, hd), (1, 0, 2))
    vh = jnp.transpose(qkv[:, 2 * E:].reshape(T, n_heads, hd), (1, 0, 2))

    # Query-tiled causal attention: live score tensor is (H, tq, T), not (H, T, T).
    # TODO(synk): full flash-style (B, T//tq) grid with online-softmax scratch and
    # causal kv-block skipping (also gives v7x's 2 TCs a second parallel axis).
    for qi in range(T // tq):
        q0 = qi * tq
        s = jnp.einsum('hqd,hkd->hqk', qh[:, q0:q0 + tq, :], kh,
                       preferred_element_type=f32)                    # (H, tq, T)
        row = lax.broadcasted_iota(jnp.int32, (tq, T), 0) + q0
        col = lax.broadcasted_iota(jnp.int32, (tq, T), 1)
        s = jnp.where((col <= row)[None], s, -1e30)
        s = s - jnp.max(s, axis=-1, keepdims=True)
        p = jnp.exp(s)
        p = p * pl.reciprocal(jnp.sum(p, axis=-1, keepdims=True), approx=True)
        ctx = jnp.einsum('hqk,hkd->hqd', p.astype(bf16), vh,
                         preferred_element_type=f32)                  # (H, tq, hd)
        ctx_scr[pl.ds(q0, tq), :] = jnp.transpose(ctx, (1, 0, 2)).reshape(tq, E)

    # Single (T, E) @ (E, E) output projection (no per-head partials, no head-sum).
    attn = jnp.dot(ctx_scr[...].astype(bf16), wo_t[...],
                   preferred_element_type=f32)                        # (T, E) f32
    x1 = xb + _layer_norm(attn, lnpg[...], lnpb[...])

    # ---- SwiGLU MLP branch (x / gate halves kept separate; v7x-safe) ----
    # TODO(synk): on v6e (128 MiB VMEM) re-fuse w1x/w1g into one (E, 2*Hm) matmul.
    h2 = _layer_norm(x1, ln2g[...], ln2b[...]).astype(bf16)
    u_x = jnp.dot(h2, w1x_t[...], preferred_element_type=f32)         # (T, Hm)
    u_g = jnp.dot(h2, w1g_t[...], preferred_element_type=f32)         # (T, Hm)
    sw = jax.nn.sigmoid(u_g) * u_g * u_x                              # F.silu(gate) * x
    sw = _layer_norm(sw, lnmg[...], lnmb[...]).astype(bf16)
    o_ref[0] = x1 + jnp.dot(sw, w2_t[...], preferred_element_type=f32)


# ---------------------------- wrappers ----------------------------

def pallas_layer_norm(x2d, g, b, *, out_dtype=jnp.float32, row_tile=512):
    M, E = x2d.shape
    tm, Mp = _pad_dim(M, row_tile, 8)
    xp = x2d if Mp == M else jnp.pad(x2d, ((0, Mp - M), (0, 0)))
    out = pl.pallas_call(
        _ln_kernel,
        out_shape=jax.ShapeDtypeStruct((Mp, E), out_dtype),
        grid=(Mp // tm,),
        in_specs=[pl.BlockSpec((tm, E), lambda i: (i, 0)),
                  pl.BlockSpec((1, E), lambda i: (0, 0)),
                  pl.BlockSpec((1, E), lambda i: (0, 0))],
        out_specs=pl.BlockSpec((tm, E), lambda i: (i, 0)),
        compiler_params=pltpu.CompilerParams(
            dimension_semantics=("parallel",),
            vmem_limit_bytes=_VMEM_LIMIT),
    )(xp, g.reshape(1, E), b.reshape(1, E))
    return out if Mp == M else out[:M]


def pallas_lm_head(x2d, w):
    """Tiled (M, K) @ (K, N) -> (M, N): bf16 operands, f32 accumulator.

    M and N are padded to tile multiples (no silent full-dim fallback), so a
    realistic vocab (e.g. 50257) never produces a giant single block.
    """
    M, K = x2d.shape
    _, N = w.shape
    tm, Mp = _pad_dim(M, 512, 128)
    tn, Np = _pad_dim(N, 1024, 128)
    tk = _pick_k_tile(K)
    xp = x2d if Mp == M else jnp.pad(x2d, ((0, Mp - M), (0, 0)))
    wp = w if Np == N else jnp.pad(w, ((0, 0), (0, Np - N)))
    out = pl.pallas_call(
        _matmul_kernel,
        out_shape=jax.ShapeDtypeStruct((Mp, Np), jnp.float32),
        grid=(Mp // tm, Np // tn, K // tk),
        in_specs=[pl.BlockSpec((tm, tk), lambda i, j, k: (i, k)),
                  pl.BlockSpec((tk, tn), lambda i, j, k: (k, j))],
        out_specs=pl.BlockSpec((tm, tn), lambda i, j, k: (i, j)),
        scratch_shapes=[pltpu.VMEM((tm, tn), jnp.float32)],
        compiler_params=pltpu.CompilerParams(
            dimension_semantics=("parallel", "parallel", "arbitrary"),
            vmem_limit_bytes=_VMEM_LIMIT),
    )(xp, wp)
    return out[:M, :N]


def _const_spec(shape, ndim, single_buffer):
    """Constant-index-map BlockSpec; single-buffered when supported."""
    idx = lambda b, nd=ndim: (0,) * nd
    if single_buffer:
        return pl.BlockSpec(shape, idx, pipeline_mode=pl.Buffered(buffer_count=1))
    return pl.BlockSpec(shape, idx)


def pallas_transformer_block(x, lp, n_heads):
    B, T, E = x.shape
    tq = 128 if (T % 128 == 0) else T
    ops = [
        lp['ln1_g'].reshape(1, E), lp['ln1_b'].reshape(1, E),
        lp['lnp_g'].reshape(1, E), lp['lnp_b'].reshape(1, E),
        lp['ln2_g'].reshape(1, E), lp['ln2_b'].reshape(1, E),
        lp['lnm_g'].reshape(1, -1), lp['lnm_b'].reshape(1, -1),
        lp['wqkv_t'], lp['wo_t'], lp['w1x_t'], lp['w1g_t'], lp['w2_t'],
    ]

    def run(single_buffer):
        in_specs = [pl.BlockSpec((1, T, E), lambda b: (b, 0, 0))]
        for op in ops:
            in_specs.append(_const_spec(op.shape, op.ndim, single_buffer))
        return pl.pallas_call(
            functools.partial(_block_kernel, n_heads=n_heads, tq=tq),
            out_shape=jax.ShapeDtypeStruct((B, T, E), jnp.float32),
            grid=(B,),
            in_specs=in_specs,
            out_specs=pl.BlockSpec((1, T, E), lambda b: (b, 0, 0)),
            scratch_shapes=[pltpu.VMEM((T, E), jnp.float32)],
            compiler_params=pltpu.CompilerParams(
                dimension_semantics=("parallel",),
                vmem_limit_bytes=_VMEM_LIMIT),
        )(x, *ops)

    try:
        # Weights / LN params have constant index maps -> single-buffer them
        # (halves resident weight VMEM; the fit-or-spill difference on v7x).
        return run(True)
    except Exception:
        return run(False)


def gpt_forward(params, tokens, n_heads):
    B, T = tokens.shape
    E = params['embed'].shape[1]
    # glue: embedding gather + positional embedding (embed_pdrop=0 -> identity)
    x = params['embed'][tokens] + params['pos_embed'][:, :T, :]
    x = pallas_layer_norm(x.reshape(B * T, E),
                          params['ln_pre_g'], params['ln_pre_b']).reshape(B, T, E)
    for lp in params['layers']:
        x = pallas_transformer_block(x, lp, n_heads)
    # ln_post emits bf16 directly (halves its HBM writeback, feeds bf16 LM head)
    xb = pallas_layer_norm(x.reshape(B * T, E),
                           params['ln_post_g'], params['ln_post_b'],
                           out_dtype=jnp.bfloat16)
    V = params['out_head_t'].shape[1]
    logits = pallas_lm_head(xb, params['out_head_t']).reshape(B, T, V)
    # TODO(synk): cross-entropy loss path (y is not None) and eval-mode KV cache
    # / top-k sampling loop are host-side control flow, not part of these kernels.
    return logits


# ---------------------------- pure-JAX reference ----------------------------

def ref_forward(params, tokens, n_heads):
    f32 = jnp.float32
    B, T = tokens.shape
    E = params['embed'].shape[1]
    x = params['embed'][tokens] + params['pos_embed'][:, :T, :]
    x = _layer_norm(x, params['ln_pre_g'], params['ln_pre_b'])
    hd = E // n_heads
    causal = jnp.tril(jnp.ones((T, T), bool))
    for lp in params['layers']:
        h = _layer_norm(x, lp['ln1_g'], lp['ln1_b'])
        qkv = h @ lp['wqkv_t'].astype(f32)
        q, k, v = jnp.split(qkv, 3, axis=-1)
        q = q.reshape(B, T, n_heads, hd).transpose(0, 2, 1, 3)
        k = k.reshape(B, T, n_heads, hd).transpose(0, 2, 1, 3)
        v = v.reshape(B, T, n_heads, hd).transpose(0, 2, 1, 3)
        s = q @ k.transpose(0, 1, 3, 2)          # 1/sqrt(hd) already folded into q weights
        s = jnp.where(causal, s, -jnp.inf)
        p = jax.nn.softmax(s, axis=-1)
        a = (p @ v).transpose(0, 2, 1, 3).reshape(B, T, E)
        a = a @ lp['wo_t'].astype(f32)
        x = x + _layer_norm(a, lp['lnp_g'], lp['lnp_b'])
        h2 = _layer_norm(x, lp['ln2_g'], lp['ln2_b'])
        xp = h2 @ lp['w1x_t'].astype(f32)
        gate = h2 @ lp['w1g_t'].astype(f32)
        sw = jax.nn.silu(gate) * xp
        sw = _layer_norm(sw, lp['lnm_g'], lp['lnm_b'])
        x = x + sw @ lp['w2_t'].astype(f32)
    x = _layer_norm(x, params['ln_post_g'], params['ln_post_b'])
    return x @ params['out_head_t'].astype(f32)


# ---------------------------- params ----------------------------

def init_params(key, n_vocab, block_size, n_embed, n_layers, n_heads, mlp_scale=4):
    H = n_embed * mlp_scale
    std = 0.02
    bf16 = jnp.bfloat16
    attn_scale = 1.0 / float(n_embed // n_heads) ** 0.5
    keys = jax.random.split(key, 3 + 4 * n_layers)
    # Matmul weights stored ONCE pre-transposed (in, out) and in bf16.
    p = {
        'embed': std * jax.random.normal(keys[0], (n_vocab, n_embed), jnp.float32),
        'pos_embed': std * jax.random.normal(keys[1], (1, block_size, n_embed), jnp.float32),
        'out_head_t': (std * jax.random.normal(keys[2], (n_vocab, n_embed),
                                               jnp.float32)).T.astype(bf16),
        'ln_pre_g': jnp.ones((n_embed,), jnp.float32),
        'ln_pre_b': jnp.zeros((n_embed,), jnp.float32),
        'ln_post_g': jnp.ones((n_embed,), jnp.float32),
        'ln_post_b': jnp.zeros((n_embed,), jnp.float32),
        'layers': [],
    }
    ki = 3
    for _ in range(n_layers):
        wqkv = std * jax.random.normal(keys[ki + 0], (3 * n_embed, n_embed), jnp.float32)
        # Fold the 1/sqrt(head_dim) attention scale into the q projection rows
        # (zero runtime cost; kernel and reference both skip score scaling).
        wqkv = wqkv.at[:n_embed].multiply(attn_scale)
        wo = std * jax.random.normal(keys[ki + 1], (n_embed, n_embed), jnp.float32)
        w1 = std * jax.random.normal(keys[ki + 2], (2 * H, n_embed), jnp.float32)
        w2 = std * jax.random.normal(keys[ki + 3], (n_embed, H), jnp.float32)
        lp = {
            'ln1_g': jnp.ones((n_embed,), jnp.float32), 'ln1_b': jnp.zeros((n_embed,), jnp.float32),
            'lnp_g': jnp.ones((n_embed,), jnp.float32), 'lnp_b': jnp.zeros((n_embed,), jnp.float32),
            'ln2_g': jnp.ones((n_embed,), jnp.float32), 'ln2_b': jnp.zeros((n_embed,), jnp.float32),
            'lnm_g': jnp.ones((H,), jnp.float32), 'lnm_b': jnp.zeros((H,), jnp.float32),
            'wqkv_t': wqkv.T.astype(bf16),          # (E, 3E), q columns pre-scaled
            'wo_t': wo.T.astype(bf16),              # (E, E)
            'w1x_t': w1[:H].T.astype(bf16),         # (E, H)  -> x part of SwiGLU
            'w1g_t': w1[H:].T.astype(bf16),         # (E, H)  -> gate part
            'w2_t': w2.T.astype(bf16),              # (H, E)
        }
        ki += 4
        p['layers'].append(lp)
    return p


if __name__ == "__main__":
    n_heads, n_layers, n_embed, block_size, n_vocab = 4, 2, 64, 16, 128
    B, T = 2, 16

    key = jax.random.PRNGKey(0)
    pkey, tkey = jax.random.split(key)
    params = init_params(pkey, n_vocab, block_size, n_embed, n_layers, n_heads)
    tokens = jax.random.randint(tkey, (B, T), 0, n_vocab, dtype=jnp.int32)

    logits = jax.block_until_ready(gpt_forward(params, tokens, n_heads))

    ref = ref_forward(params, tokens, n_heads)
    assert logits.shape == (B, T, n_vocab)
    max_err = jnp.max(jnp.abs(logits - ref))
    # bf16 matmul operands + approx-reciprocal softmax vs f32 reference.
    assert jnp.allclose(logits, ref, atol=3e-2, rtol=3e-2), \
        f"mismatch vs reference (max abs err {max_err})"
    print("KERNEL_OK")
</pallas_src>

<mosaic_0001>
module attributes {stable_mosaic.version = 11 : i64} {
  func.func @_ln_kernel(%arg0: i32, %arg1: memref<32x64xf32, #tpu.memory_space<vmem>>, %arg2: memref<1x64xf32, #tpu.memory_space<vmem>>, %arg3: memref<1x64xf32, #tpu.memory_space<vmem>>, %arg4: memref<32x64xf32, #tpu.memory_space<vmem>>) attributes {dimension_semantics = [#tpu.dimension_semantics<parallel>], iteration_bounds = array<i64: 1>, scalar_prefetch = 0 : i64, scratch_operands = 0 : i64, tpu.core_type = #tpu.core_type<tc>, window_params = [{transform_indices = @transform_0, window_bounds = array<i64: 32, 64>}, {pipeline_mode = #tpu.pipeline_mode<synchronous>, transform_indices = @transform_1, window_bounds = array<i64: 1, 64>}, {pipeline_mode = #tpu.pipeline_mode<synchronous>, transform_indices = @transform_2, window_bounds = array<i64: 1, 64>}, {transform_indices = @transform_3, window_bounds = array<i64: 32, 64>}]} {
    %c0 = arith.constant 0 : index
    %c0_0 = arith.constant 0 : index
    %0 = vector.load %arg1[%c0, %c0_0] : memref<32x64xf32, #tpu.memory_space<vmem>>, vector<32x64xf32>
    %c0_1 = arith.constant 0 : index
    %c0_2 = arith.constant 0 : index
    %1 = vector.load %arg2[%c0_1, %c0_2] : memref<1x64xf32, #tpu.memory_space<vmem>>, vector<1x64xf32>
    %c0_3 = arith.constant 0 : index
    %c0_4 = arith.constant 0 : index
    %2 = vector.load %arg3[%c0_3, %c0_4] : memref<1x64xf32, #tpu.memory_space<vmem>>, vector<1x64xf32>
    %cst = arith.constant dense<0.000000e+00> : vector<32xf32>
    %3 = vector.multi_reduction <add>, %0, %cst [1] : vector<32x64xf32> to vector<32xf32>
    %4 = vector.shape_cast %3 : vector<32xf32> to vector<32x1xf32>
    %cst_5 = arith.constant 6.400000e+01 : f32
    %5 = vector.broadcast %cst_5 : f32 to vector<32x1xf32>
    %6 = arith.divf %4, %5 : vector<32x1xf32>
    %7 = vector.broadcast %6 : vector<32x1xf32> to vector<32x64xf32>
    %8 = arith.subf %0, %7 : vector<32x64xf32>
    %9 = arith.mulf %8, %8 : vector<32x64xf32>
    %cst_6 = arith.constant dense<0.000000e+00> : vector<32xf32>
    %10 = vector.multi_reduction <add>, %9, %cst_6 [1] : vector<32x64xf32> to vector<32xf32>
    %11 = vector.shape_cast %10 : vector<32xf32> to vector<32x1xf32>
    %cst_7 = arith.constant 6.400000e+01 : f32
    %12 = vector.broadcast %cst_7 : f32 to vector<32x1xf32>
    %13 = arith.divf %11, %12 : vector<32x1xf32>
    %14 = vector.broadcast %6 : vector<32x1xf32> to vector<32x64xf32>
    %15 = arith.subf %0, %14 : vector<32x64xf32>
    %cst_8 = arith.constant 9.99999974E-6 : f32
    %16 = vector.broadcast %cst_8 : f32 to vector<32x1xf32>
    %17 = arith.addf %13, %16 : vector<32x1xf32>
    %18 = math.rsqrt %17 : vector<32x1xf32>
    %19 = vector.broadcast %18 : vector<32x1xf32> to vector<32x64xf32>
    %20 = arith.mulf %15, %19 : vector<32x64xf32>
    %21 = vector.broadcast %1 : vector<1x64xf32> to vector<32x64xf32>
    %22 = arith.mulf %20, %21 : vector<32x64xf32>
    %23 = vector.broadcast %2 : vector<1x64xf32> to vector<32x64xf32>
    %24 = arith.addf %22, %23 : vector<32x64xf32>
    %c0_9 = arith.constant 0 : index
    %c0_10 = arith.constant 0 : index
    %25 = vector.load %arg4[%c0_9, %c0_10] : memref<32x64xf32, #tpu.memory_space<vmem>>, vector<32x64xf32>
    tpu.vector_store %arg4[%c0_9, %c0_10], %24 {strides = array<i32>} : memref<32x64xf32, #tpu.memory_space<vmem>>, vector<32x64xf32>,
    return
  }
  func.func @transform_0(%arg0: i32) -> (i32, i32) {
    %c0_i32 = arith.constant 0 : i32
    %c0_i32_0 = arith.constant 0 : i32
    return %arg0, %c0_i32 : i32, i32
  }
  func.func @transform_1(%arg0: i32) -> (i32, i32) {
    %c0_i32 = arith.constant 0 : i32
    %c0_i32_0 = arith.constant 0 : i32
    %c0_i32_1 = arith.constant 0 : i32
    return %c0_i32, %c0_i32_0 : i32, i32
  }
  func.func @transform_2(%arg0: i32) -> (i32, i32) {
    %c0_i32 = arith.constant 0 : i32
    %c0_i32_0 = arith.constant 0 : i32
    %c0_i32_1 = arith.constant 0 : i32
    return %c0_i32, %c0_i32_0 : i32, i32
  }
  func.func @transform_3(%arg0: i32) -> (i32, i32) {
    %c0_i32 = arith.constant 0 : i32
    %c0_i32_0 = arith.constant 0 : i32
    return %arg0, %c0_i32 : i32, i32
  }
}

</mosaic_0001>

<bundles_post_ra>
// kernel: tpu_custom_call.1
= control target key start
LH: loop header
LB: loop body
LE: loop exit
PB: predicated region body
PF: predicated region fallthrough
CT: control target
= control target key end

     0   :  { %8 = vsyncpa [#allocation3], 0  ;;  %s242_s0 = inlined_call_operand.hbm [shape: f32[32,64], index: 0, kind: input, shape index: {}]   ;;  %s243_s1 = inlined_call_operand.vmem [shape: f32[1,64], index: 1, kind: input, shape index: {}]   ;;  %s244_s2 = inlined_call_operand.vmem [shape: f32[1,64], index: 2, kind: input, shape index: {}]   ;;  %s245_s3 = inlined_call_operand.hbm [shape: f32[32,64], index: 3, kind: output, shape index: {}]  }
   0x1   :  { %9 = vsyncpa [#allocation4], 0  ;;  %s188_s12 = smov [#allocation2]  }
   0x2   :  { %s15_s13 = sshll.u32 %s188_s12, 4  ;;  %s16_s13 = int_to_ptr.vmem [resolvable:$true] %s15_s13 }
   0x3   :  { %s152_s14 = scalar_lea.vmem %s16_s13, 512  ;;  %p157_p1 = scmp.lt.s32.totalorder %s16_s13, %s16_s13 }
   0x4   :  { %p153_p0 = scmp.ne.s32.totalorder %s16_s13, %s152_s14  ;;  %p158_p2 = scmp.lt.s32.totalorder %s152_s14, %s152_s14 }
   0x6   :  { %p159_p3 = por %p158_p2, %p157_p1 }
   0x8   :  { %p160_p4 = pnand %p159_p3, %p153_p0 }
   0xa   :  { %163 = shalt.err (!%p160_p4)
}
   0xb   :  { %s189_s15 = smov 128   ;;  %s190_s16 = smov 8  }
   0xc   :  { %21 = dma.hbm_to_vmem [thread:$0]  %s242_s0, 512, %s16_s13, [#allocation3], %s189_s15, %s189_s15, %s190_s16  }
   0xd   :  { %184 = dma.done.wait [#allocation3], 512  }
   0xe   :  { %185 = vsyncadd [#allocation3], 4294966784  ;;  %vm35_vm0 = vcmask 523264   ;;  %v29_v0 = vld [vmem:[#allocation2] sm:$0xff]  ;;  %v31_v1 = vld [vmem:[#allocation2 + $0x10] sm:$0xff] }
   0xf   :  { %v30_v2 = vld [vmem:[#allocation2 + $0x8] sm:$0xff]  ;;  %v36_v3 = vsel %vm35_vm0, %v29_v0, 0.0  ;;  %v42_v4 = vsel %vm35_vm0, %v31_v1, 0.0  ;;  %v32_v5 = vld [vmem:[#allocation2 + $0x18] sm:$0xff]  ;;  %v130_v41 = vld [vmem:[%s243_s1] ss:$0 sm:$0xff] }
  0x10   :  { %37 = vadd.xlane.f32.xlu0 %v36_v3  ;;  %43 = vadd.xlane.f32.xlu1 %v42_v4  ;;  %v39_v6 = vsel %vm35_vm0, %v30_v2, 0.0  ;;  %v45_v7 = vsel %vm35_vm0, %v32_v5, 0.0  ;;  %v131_v43 = vld [vmem:[%s244_s2] ss:$0 sm:$0xff]  ;;  %s191_s1 = smov [#allocation5]  }
  0x11   :  { %s118_s22 = sshll.u32 %s191_s1, 4  ;;  %s119_s22 = int_to_ptr.vmem [resolvable:$true] %s118_s22 }
  0x12   :  { %s164_s2 = scalar_lea.vmem %s119_s22, 512  ;;  %p169_p6 = scmp.lt.s32.totalorder %s119_s22, %s119_s22 }
  0x13   :  { %p165_p5 = scmp.ne.s32.totalorder %s119_s22, %s164_s2  ;;  %p170_p7 = scmp.lt.s32.totalorder %s164_s2, %s164_s2 }
  0x14   :  { %40 = vadd.xlane.f32.xlu0 %v39_v6  ;;  %46 = vadd.xlane.f32.xlu1 %v45_v7 }
  0x15   :  { %p171_p8 = por %p170_p7, %p169_p6 }
  0x17   :  { %p172_p9 = pnand %p171_p8, %p165_p5 }
  0x99   :  { %v38_v8 = vpop.xlane.xlu0 %37  ;;  %v44_v9 = vpop.xlane.xlu1 %43 }
  0x9a   :  { %v49_v10 = vmul.f32 0.015625, %v38_v8  ;;  %v51_v11 = vmul.f32 0.015625, %v44_v9 }
  0x9c   :  { %v53_v12 = vsub.f32 %v29_v0, %v49_v10  ;;  %v55_v13 = vsub.f32 %v31_v1, %v51_v11 }
  0x9d   :  { %v41_v14 = vpop.xlane.xlu0 %40  ;;  %v47_v15 = vpop.xlane.xlu1 %46 }
  0x9e   :  { %v50_v16 = vmul.f32 0.015625, %v41_v14  ;;  %v52_v17 = vmul.f32 0.015625, %v47_v15  ;;  %v57_v18 = vmul.f32 %v53_v12, %v53_v12  ;;  %v59_v19 = vmul.f32 %v55_v13, %v55_v13 }
  0xa0   :  { %v54_v20 = vsub.f32 %v30_v2, %v50_v16  ;;  %v56_v21 = vsub.f32 %v32_v5, %v52_v17  ;;  %v61_v22 = vsel %vm35_vm0, %v57_v18, 0.0  ;;  %v67_v23 = vsel %vm35_vm0, %v59_v19, 0.0 }
  0xa1   :  { %62 = vadd.xlane.f32.xlu0 %v61_v22 }
  0xa2   :  { %v58_v24 = vmul.f32 %v54_v20, %v54_v20  ;;  %v60_v25 = vmul.f32 %v56_v21, %v56_v21 }
  0xa4   :  { %v64_v26 = vsel %vm35_vm0, %v58_v24, 0.0  ;;  %v70_v27 = vsel %vm35_vm0, %v60_v25, 0.0 }
  0xa5   :  { %68 = vadd.xlane.f32.xlu0 %v67_v23  ;;  %65 = vadd.xlane.f32.xlu1 %v64_v26 }
  0xa9   :  { %71 = vadd.xlane.f32.xlu1 %v70_v27 }
 0x12a   :  { %v63_v28 = vpop.xlane.xlu0 %62 }
 0x12b   :  { %v73_v29 = vmul.f32 0.015625, %v63_v28 }
 0x12d   :  { %v77_v30 = vadd.f32 1e-05, %v73_v29 }
 0x12e   :  { %v66_v31 = vpop.xlane.xlu1 %65  ;;  %v69_v32 = vpop.xlane.xlu0 %68 }
 0x12f   :  { %136 = vrsqrt.f32 %v77_v30  ;;  %v74_v33 = vmul.f32 0.015625, %v66_v31  ;;  %v75_v34 = vmul.f32 0.015625, %v69_v32 }
 0x131   :  { %v78_v35 = vadd.f32 1e-05, %v74_v33  ;;  %v79_v36 = vadd.f32 1e-05, %v75_v34 }
 0x132   :  { %v72_v37 = vpop.xlane.xlu1 %71 }
 0x133   :  { %138 = vrsqrt.f32 %v78_v35  ;;  %v76_v38 = vmul.f32 0.015625, %v72_v37 }
 0x134   :  { %140 = vrsqrt.f32 %v79_v36 }
 0x135   :  { %v80_v39 = vadd.f32 1e-05, %v76_v38 }
 0x137   :  { %142 = vrsqrt.f32 %v80_v39 }
 0x13c   :  { %v137_v40 = vpop.eup %136 }
 0x13d   :  { %v85_v42 = vmul.f32 %v137_v40, %v53_v12 }
 0x13f   :  { %v95_v44 = vmul.f32 %v130_v41, %v85_v42 }
 0x140   :  { %v139_v45 = vpop.eup %138 }
 0x141   :  { %v141_v46 = vpop.eup %140  ;;  %v86_v47 = vmul.f32 %v139_v45, %v54_v20  ;;  %v105_v48 = vadd.f32 %v131_v43, %v95_v44 }
 0x142   :  { %v87_v49 = vmul.f32 %v141_v46, %v55_v13 }
 0x143   :  { %v96_v50 = vmul.f32 %v130_v41, %v86_v47  ;;  %109 = vst.msk [vmem:[#allocation5] sm:$0xff] %vm35_vm0, %v105_v48 }
 0x144   :  { %v143_v51 = vpop.eup %142  ;;  %v97_v52 = vmul.f32 %v130_v41, %v87_v49 }
 0x145   :  { %v88_v53 = vmul.f32 %v143_v51, %v56_v21  ;;  %v106_v54 = vadd.f32 %v131_v43, %v96_v50 }
 0x146   :  { %v107_v55 = vadd.f32 %v131_v43, %v97_v52 }
 0x147   :  { %v98_v56 = vmul.f32 %v130_v41, %v88_v53  ;;  %110 = vst.msk [vmem:[#allocation5 + $0x8] sm:$0xff] %vm35_vm0, %v106_v54 }
 0x148   :  { %111 = vst.msk [vmem:[#allocation5 + $0x10] sm:$0xff] %vm35_vm0, %v107_v55 }
 0x149   :  { %v108_v57 = vadd.f32 %v131_v43, %v98_v56 }
 0x14b   :  { %112 = vst.msk [vmem:[#allocation5 + $0x18] sm:$0xff] %vm35_vm0, %v108_v57 }
 0x14c   :  { %175 = shalt.err (!%p172_p9)
}
 0x14d   :  { %124 = dma.vmem_to_hbm [thread:$0]  %s119_s22, 512, %s245_s3, [#allocation4], %s189_s15, %s189_s15, %s190_s16  }
 0x14e   :  { %186 = dma.done.wait [#allocation4], 512  }
 0x14f   :  { %187 = vsyncadd [#allocation4], 4294966784 }
 0x150   :  { %128 = vsyncpa [#allocation3], 1 }
 0x151   :  { %129 = vsyncpa [#allocation4], 1 }

</bundles_post_ra>
